<compile_context>
chip_gen: v6e
topology: v6e:2x2x1
jax: 0.10.0
libtpu: 0.0.40
codegen_flags: <defaults>
</compile_context>

<pallas_src>
import jax
import jax.numpy as jnp
from jax import lax
from jax.experimental import pallas as pl
from jax.experimental.pallas import tpu as pltpu


def _round_up(x, m):
    return ((x + m - 1) // m) * m


# Per-buffer cap for streamed inputs: with double-buffering of each streamed
# input plus the resident q block and the f32 output tiles, this stays well
# inside the scoped VMEM limit requested below on every generation
# (v5e: 16 MiB scoped default; v6e: 128 MiB physical; v7x: 64 MiB physical,
# shared budget sized per-TensorCore).
_PER_BUFFER_BYTES = 4 << 20


def _scoped_vmem_limit():
    # Explicitly raise v5e's 16 MiB scoped default; stay under v7x's 64 MiB
    # physical VMEM (per TensorCore) even with both cores active.
    phys = 64 << 20
    try:
        phys = int(getattr(pltpu.get_tpu_info(), "vmem_capacity_bytes", phys))
    except Exception:
        pass
    return int(min(32 << 20, max(16 << 20, phys // 2)))


# ---------------------------------------------------------------------------
# Kernels
# ---------------------------------------------------------------------------
def _interaction_kernel(sub_ref, rel_ref, c_ref, b0_ref, q_ref):
    sub_I = c_ref[...] * sub_ref[...]                   # c_emb * sub_emb
    rel_I = sub_I * rel_ref[...]                        # sub_I * rel_emb
    q_ref[...] = jnp.tanh(sub_I + rel_I + b0_ref[...])  # q_sr, (B, D)


def _one_to_n_score_kernel(q_ref, w_ref, bias_ref, out_ref):
    # q was pre-cast to the streamed dtype in the wrapper (no per-step cast of
    # the resident block). Contract the last dims of both operands so no
    # in-kernel transpose / relayout is needed.
    # TODO(synk): verify via MLIR dump that no per-tile XLU transpose is
    # emitted; if it is, store the table as (D, E) once and stream (D, tile_e).
    logits = lax.dot_general(
        q_ref[...], w_ref[...],
        dimension_numbers=(((1,), (1,)), ((), ())),
        preferred_element_type=jnp.float32)
    out_ref[...] = jax.nn.sigmoid(logits + bias_ref[...])


def _one_to_x_score_kernel(q_ref, neg_ref, negb_ref, out_ref):
    # (q.unsqueeze(1) * ent_embed(neg_ents)).sum(-1): multiply in the streamed
    # dtype (bf16 on v6e/v7x), accumulate the lane reduction in f32.
    prod = q_ref[...][:, None, :] * neg_ref[...]          # (B, tile_n, D)
    x = jnp.sum(prod, axis=-1, dtype=jnp.float32)         # (B, tile_n) f32
    out_ref[...] = jax.nn.sigmoid(x + negb_ref[...])


def _one_to_x_gather_kernel(neg_ref, q_ref, negb_ref, ent_hbm_ref, out_ref,
                            rowbuf, sem):
    # grid = (num_neg_tiles, Bp); the output tile stays resident across the
    # inner batch axis and each step fills in its own row.
    t = pl.program_id(0)
    b = pl.program_id(1)
    tile_n = rowbuf.shape[0]
    base = t * tile_n

    @pl.when(b == 0)
    def _():
        out_ref[...] = jnp.zeros_like(out_ref)

    # Issue all row-gather DMAs for this (b, tile) so they run concurrently,
    # then drain the semaphore. All copies are equal-sized, so the waits can be
    # satisfied in any completion order.
    def _issue(i, carry):
        row = neg_ref[b, base + i]
        pltpu.make_async_copy(ent_hbm_ref.at[pl.ds(row, 1)],
                              rowbuf.at[pl.ds(i, 1)], sem).start()
        return carry
    lax.fori_loop(0, tile_n, _issue, 0)

    def _drain(i, carry):
        pltpu.make_async_copy(ent_hbm_ref.at[pl.ds(0, 1)],
                              rowbuf.at[pl.ds(i, 1)], sem).wait()
        return carry
    lax.fori_loop(0, tile_n, _drain, 0)

    # Score all batch rows against this row's gathered negatives (cheap, the
    # step is DMA-bound) and keep only row b of the result.
    logits = lax.dot_general(
        q_ref[...], rowbuf[...],
        dimension_numbers=(((1,), (1,)), ((), ())),
        preferred_element_type=jnp.float32)                # (Bp, tile_n)
    vals = jax.nn.sigmoid(logits + negb_ref[...])
    row_ids = lax.broadcasted_iota(jnp.int32, vals.shape, 0)
    out_ref[...] = jnp.where(row_ids == b, vals, out_ref[...])


# ---------------------------------------------------------------------------
# Setup-time preparation (hoisted out of the per-call path)
# ---------------------------------------------------------------------------
def prepare_entity_table(ent_w, bias, *, stream_dtype=None, tile_e=1024):
    """Pre-cast / pre-pad the entity table ONCE at parameter-setup time.

    one_to_n is bound by a single HBM read of this table; doing the cast/pad
    per call would add a full-table read+write before the kernel starts.
    """
    E, D = ent_w.shape
    if stream_dtype is not None and ent_w.dtype != stream_dtype:
        ent_w = ent_w.astype(stream_dtype)
    itemsize = jnp.dtype(ent_w.dtype).itemsize
    max_rows = max(256, (_PER_BUFFER_BYTES // (D * itemsize)) // 256 * 256)
    tile_e = _round_up(min(tile_e, _round_up(E, 256), max_rows), 256)
    Ep = _round_up(E, tile_e)
    if Ep != E:
        ent_w = jnp.pad(ent_w, ((0, Ep - E), (0, 0)))
        bias = jnp.pad(bias, (0, Ep - E))
    bias2 = bias.reshape(1, Ep).astype(jnp.float32)
    # TODO(synk): add an int8 (v6e) / fp8 (v7x) quantized table + per-row scale
    # fast path to further halve/quarter the bandwidth-bound entity stream.
    return {"table": ent_w, "bias": bias2, "num_ent": E, "tile_e": tile_e}


# ---------------------------------------------------------------------------
# Wrappers
# ---------------------------------------------------------------------------
def crosse_interaction(sub_emb, rel_emb, c_emb, bias0, *, use_pallas=None):
    """q_sr = tanh(c*s + c*s*r + b0), shape (B, D). Computed once, reused."""
    B, D = sub_emb.shape
    if use_pallas is None:
        # At tiny B the pallas_call fixed overhead + q_sr HBM round-trip exceed
        # the few KiB of compute; stay in plain jnp (XLA fuses it).
        use_pallas = B >= 64
    sub_emb = sub_emb.astype(jnp.float32)
    rel_emb = rel_emb.astype(jnp.float32)
    c_emb = c_emb.astype(jnp.float32)
    b0 = bias0.astype(jnp.float32)
    if not use_pallas:
        sub_I = c_emb * sub_emb
        rel_I = sub_I * rel_emb
        return jnp.tanh(sub_I + rel_I + b0[None, :])

    Bp = _round_up(B, 8)
    if Bp != B:
        pad = ((0, Bp - B), (0, 0))
        sub_emb = jnp.pad(sub_emb, pad)
        rel_emb = jnp.pad(rel_emb, pad)
        c_emb = jnp.pad(c_emb, pad)
    q = pl.pallas_call(
        _interaction_kernel,
        out_shape=jax.ShapeDtypeStruct((Bp, D), jnp.float32),
    )(sub_emb, rel_emb, c_emb, b0.reshape(1, D))
    return q[:B]


def crosse_one_to_n(q_sr, prepared):
    """pred = sigmoid(q_sr @ ent_weight.T + bias), shape (B, num_ent).

    `prepared` comes from prepare_entity_table (already cast / padded)."""
    table = prepared["table"]
    bias2 = prepared["bias"]
    E = prepared["num_ent"]
    tile_e = prepared["tile_e"]
    Ep, D = table.shape

    B = q_sr.shape[0]
    Bp = _round_up(B, 8)
    q = q_sr.astype(table.dtype)          # cast once here, not per grid step
    if Bp != B:
        q = jnp.pad(q, ((0, Bp - B), (0, 0)))

    out = pl.pallas_call(
        _one_to_n_score_kernel,
        out_shape=jax.ShapeDtypeStruct((Bp, Ep), jnp.float32),
        grid_spec=pltpu.PrefetchScalarGridSpec(
            num_scalar_prefetch=0,
            grid=(Ep // tile_e,),
            in_specs=[
                pl.BlockSpec((Bp, D), lambda e: (0, 0)),       # q_sr (resident)
                pl.BlockSpec((tile_e, D), lambda e: (e, 0)),   # entity table tile
                pl.BlockSpec((1, tile_e), lambda e: (0, e)),   # bias tile
            ],
            out_specs=pl.BlockSpec((Bp, tile_e), lambda e: (0, e)),
        ),
        compiler_params=pltpu.CompilerParams(
            dimension_semantics=("parallel",),
            vmem_limit_bytes=_scoped_vmem_limit()),
    )(q, table, bias2)
    return out[:B, :E]


def crosse_one_to_x_gathered(q_sr, ent_table, bias, neg_ents, *, tile_n=256):
    """pred = sigmoid((q_sr[:,None,:]*ent[neg_ents]).sum(-1) + bias[neg_ents]).

    The (B, N, D) gather is done IN-KERNEL: neg_ents is scalar-prefetched into
    SMEM and each tile's rows are fetched from the HBM-resident entity table
    with per-row async DMAs (no (B, N, D) HBM materialisation / read-back).
    """
    B, D = q_sr.shape
    _, N = neg_ents.shape

    Bp = _round_up(B, 8)
    itemsize = jnp.dtype(ent_table.dtype).itemsize
    max_rows = max(128, (_PER_BUFFER_BYTES // (D * itemsize)) // 128 * 128)
    tile_n = _round_up(min(tile_n, _round_up(N, 128), max_rows), 128)
    Np = _round_up(N, tile_n)

    q = q_sr.astype(ent_table.dtype)
    if Bp != B:
        q = jnp.pad(q, ((0, Bp - B), (0, 0)))
        neg_ents = jnp.pad(neg_ents, ((0, Bp - B), (0, 0)))
    if Np != N:
        neg_ents = jnp.pad(neg_ents, ((0, 0), (0, Np - N)))
    neg_ents = neg_ents.astype(jnp.int32)
    neg_bias = bias[neg_ents].astype(jnp.float32)      # tiny (Bp, Np) gather

    out = pl.pallas_call(
        _one_to_x_gather_kernel,
        out_shape=jax.ShapeDtypeStruct((Bp, Np), jnp.float32),
        grid_spec=pltpu.PrefetchScalarGridSpec(
            num_scalar_prefetch=1,                       # neg_ents -> SMEM
            grid=(Np // tile_n, Bp),
            in_specs=[
                pl.BlockSpec((Bp, D), lambda t, b, neg: (0, 0)),       # q (resident)
                pl.BlockSpec((Bp, tile_n), lambda t, b, neg: (0, t)),  # gathered bias
                pl.BlockSpec(memory_space=pl.ANY),                     # entity table (HBM)
            ],
            out_specs=pl.BlockSpec((Bp, tile_n), lambda t, b, neg: (0, t)),
            scratch_shapes=[
                pltpu.VMEM((tile_n, D), ent_table.dtype),
                pltpu.SemaphoreType.DMA(()),
            ],
        ),
        compiler_params=pltpu.CompilerParams(
            dimension_semantics=("parallel", "arbitrary"),
            vmem_limit_bytes=_scoped_vmem_limit()),
    )(neg_ents, q, neg_bias, ent_table)
    return out[:B, :N]


def crosse_one_to_x(q_sr, neg_emb, neg_bias, *, tile_n=512, stream_dtype=None):
    """Fallback one_to_x path over a pre-materialised (B, N, D) gather.

    Prefer crosse_one_to_x_gathered (in-kernel gather from the HBM table)."""
    B, D = q_sr.shape
    _, N, _ = neg_emb.shape
    if stream_dtype is not None and neg_emb.dtype != stream_dtype:
        neg_emb = neg_emb.astype(stream_dtype)
    q = q_sr.astype(neg_emb.dtype)        # cast once here, not per grid step

    Bp = _round_up(B, 8)
    itemsize = jnp.dtype(neg_emb.dtype).itemsize
    max_cols = max(128, (_PER_BUFFER_BYTES // (Bp * D * itemsize)) // 128 * 128)
    tile_n = _round_up(min(tile_n, _round_up(N, 128), max_cols), 128)
    Np = _round_up(N, tile_n)

    if Bp != B or Np != N:
        q = jnp.pad(q, ((0, Bp - B), (0, 0)))
        neg_emb = jnp.pad(neg_emb, ((0, Bp - B), (0, Np - N), (0, 0)))
        neg_bias = jnp.pad(neg_bias, ((0, Bp - B), (0, Np - N)))
    neg_bias = neg_bias.astype(jnp.float32)

    # TODO(synk): on v7x consider pipeline_mode=pl.Buffered(3) on the negatives
    # stream when tile_n <= 512 to hide DMA issue latency at 3.2 TB/s HBM.
    out = pl.pallas_call(
        _one_to_x_score_kernel,
        out_shape=jax.ShapeDtypeStruct((Bp, Np), jnp.float32),
        grid_spec=pltpu.PrefetchScalarGridSpec(
            num_scalar_prefetch=0,
            grid=(Np // tile_n,),
            in_specs=[
                pl.BlockSpec((Bp, D), lambda n: (0, 0)),             # q_sr (resident)
                pl.BlockSpec((Bp, tile_n, D), lambda n: (0, n, 0)),  # negatives tile
                pl.BlockSpec((Bp, tile_n), lambda n: (0, n)),        # neg bias tile
            ],
            out_specs=pl.BlockSpec((Bp, tile_n), lambda n: (0, n)),
        ),
        compiler_params=pltpu.CompilerParams(
            dimension_semantics=("parallel",),
            vmem_limit_bytes=_scoped_vmem_limit()),
    )(q, neg_emb, neg_bias)
    return out[:B, :N]


# ---------------------------------------------------------------------------
# Reference (pure JAX) for verification
# ---------------------------------------------------------------------------
def _ref_forward(ent_w, rel_w, c_w, bias0, bias, sub, rel, neg_ents, strategy):
    sub_emb = ent_w[sub]
    rel_emb = rel_w[rel]
    c_emb = c_w[rel]
    sub_I = c_emb * sub_emb
    rel_I = sub_I * rel_emb
    q_sr = jnp.tanh(sub_I + rel_I + bias0[None, :])
    if strategy == 'one_to_n':
        x = q_sr @ ent_w.T + bias[None, :]
    else:
        x = (q_sr[:, None, :] * ent_w[neg_ents]).sum(-1) + bias[neg_ents]
    return jax.nn.sigmoid(x)


# ---------------------------------------------------------------------------
# Main
# ---------------------------------------------------------------------------
if __name__ == "__main__":
    # small, TPU-tile-friendly hyperparameters
    num_ent, num_rel, embed_dim = 4096, 4, 128
    batch, n_neg = 8, 256
    # TODO(synk): real workloads should batch 128-256 queries per call so the
    # entity-table HBM stream is amortised across the batch (caller-side).

    key = jax.random.PRNGKey(0)
    k_ent, k_rel, k_c, k_sub, k_r, k_neg = jax.random.split(key, 6)

    def xavier_normal(k, shape):
        fan_in, fan_out = shape[1], shape[0]
        std = (2.0 / (fan_in + fan_out)) ** 0.5
        return std * jax.random.normal(k, shape, dtype=jnp.float32)

    ent_w = xavier_normal(k_ent, (num_ent, embed_dim))
    rel_w = xavier_normal(k_rel, (num_rel * 2, embed_dim))
    c_w = xavier_normal(k_c, (num_rel * 2, embed_dim))
    bias0 = jnp.zeros((embed_dim,), jnp.float32)
    bias = jnp.zeros((num_ent,), jnp.float32)

    sub = jax.random.randint(k_sub, (batch,), 0, num_ent)
    rel = jax.random.randint(k_r, (batch,), 0, num_rel * 2)
    neg_ents = jax.random.randint(k_neg, (batch, n_neg), 0, num_ent)

    # --- parameter-setup-time prep (hoisted out of the per-call path) ---
    prep_f32 = prepare_entity_table(ent_w, bias)
    prep_bf16 = prepare_entity_table(ent_w, bias, stream_dtype=jnp.bfloat16)

    # query-side embedding lookups (tiny) stay in plain JAX
    sub_emb = ent_w[sub]
    rel_emb = rel_w[rel]
    c_emb = c_w[rel]
    neg_emb = ent_w[neg_ents]          # only used by the fallback one_to_x path
    neg_bias = bias[neg_ents]

    ref_n = _ref_forward(ent_w, rel_w, c_w, bias0, bias, sub, rel, neg_ents, 'one_to_n')
    ref_x = _ref_forward(ent_w, rel_w, c_w, bias0, bias, sub, rel, neg_ents, 'one_to_x')

    # interaction: plain jnp at B=8 (pallas_call overhead dominates there);
    # the Pallas interaction kernel is verified alongside.
    q_sr = jax.block_until_ready(crosse_interaction(sub_emb, rel_emb, c_emb, bias0))
    q_sr_pl = jax.block_until_ready(
        crosse_interaction(sub_emb, rel_emb, c_emb, bias0, use_pallas=True))
    assert jnp.allclose(q_sr, q_sr_pl, atol=1e-5), "interaction kernel mismatch"

    # --- one_to_n (MXU matmul against the streamed, pre-prepared entity table) ---
    pred_n = jax.block_until_ready(crosse_one_to_n(q_sr, prep_f32))
    assert pred_n.shape == (batch, num_ent)
    assert jnp.allclose(pred_n, ref_n, atol=1e-5), "one_to_n mismatch"

    # --- one_to_x with in-kernel gather of ent_embed(neg_ents) from HBM ---
    pred_xg = jax.block_until_ready(
        crosse_one_to_x_gathered(q_sr, prep_f32["table"], bias, neg_ents))
    assert pred_xg.shape == (batch, n_neg)
    assert jnp.allclose(pred_xg, ref_x, atol=1e-4), "one_to_x gather mismatch"

    # --- one_to_x fallback on a pre-materialised (B, N, D) gather ---
    pred_x = jax.block_until_ready(crosse_one_to_x(q_sr, neg_emb, neg_bias))
    assert jnp.allclose(pred_x, ref_x, atol=1e-5), "one_to_x mismatch"

    # --- bf16-streamed variants (halve the dominant HBM stream, f32 accumulate) ---
    pred_n_bf = jax.block_until_ready(crosse_one_to_n(q_sr, prep_bf16))
    assert jnp.allclose(pred_n_bf, ref_n, atol=2e-2), "one_to_n bf16 mismatch"

    pred_xg_bf = jax.block_until_ready(
        crosse_one_to_x_gathered(q_sr, prep_bf16["table"], bias, neg_ents))
    assert jnp.allclose(pred_xg_bf, ref_x, atol=2e-2), "one_to_x gather bf16 mismatch"

    pred_x_bf = jax.block_until_ready(
        crosse_one_to_x(q_sr, neg_emb, neg_bias, stream_dtype=jnp.bfloat16))
    assert jnp.allclose(pred_x_bf, ref_x, atol=2e-2), "one_to_x bf16 mismatch"

    print("KERNEL_OK")
</pallas_src>

<mosaic_0001>
module attributes {stable_mosaic.version = 11 : i64} {
  func.func @_interaction_kernel(%arg0: memref<8x128xf32, #tpu.memory_space<vmem>>, %arg1: memref<8x128xf32, #tpu.memory_space<vmem>>, %arg2: memref<8x128xf32, #tpu.memory_space<vmem>>, %arg3: memref<1x128xf32, #tpu.memory_space<vmem>>, %arg4: memref<8x128xf32, #tpu.memory_space<vmem>>) attributes {dimension_semantics = [], scalar_prefetch = 0 : i64, scratch_operands = 0 : i64, tpu.core_type = #tpu.core_type<tc>} {
    %c0 = arith.constant 0 : index
    %c0_0 = arith.constant 0 : index
    %0 = vector.load %arg2[%c0, %c0_0] : memref<8x128xf32, #tpu.memory_space<vmem>>, vector<8x128xf32>
    %c0_1 = arith.constant 0 : index
    %c0_2 = arith.constant 0 : index
    %1 = vector.load %arg0[%c0_1, %c0_2] : memref<8x128xf32, #tpu.memory_space<vmem>>, vector<8x128xf32>
    %2 = arith.mulf %0, %1 : vector<8x128xf32>
    %c0_3 = arith.constant 0 : index
    %c0_4 = arith.constant 0 : index
    %3 = vector.load %arg1[%c0_3, %c0_4] : memref<8x128xf32, #tpu.memory_space<vmem>>, vector<8x128xf32>
    %4 = arith.mulf %2, %3 : vector<8x128xf32>
    %5 = arith.addf %2, %4 : vector<8x128xf32>
    %c0_5 = arith.constant 0 : index
    %c0_6 = arith.constant 0 : index
    %6 = vector.load %arg3[%c0_5, %c0_6] : memref<1x128xf32, #tpu.memory_space<vmem>>, vector<1x128xf32>
    %7 = vector.broadcast %6 : vector<1x128xf32> to vector<8x128xf32>
    %8 = arith.addf %5, %7 : vector<8x128xf32>
    %9 = math.tanh %8 : vector<8x128xf32>
    %c0_7 = arith.constant 0 : index
    %c0_8 = arith.constant 0 : index
    %10 = vector.load %arg4[%c0_7, %c0_8] : memref<8x128xf32, #tpu.memory_space<vmem>>, vector<8x128xf32>
    tpu.vector_store %arg4[%c0_7, %c0_8], %9 {strides = array<i32>} : memref<8x128xf32, #tpu.memory_space<vmem>>, vector<8x128xf32>,
    return
  }
}

</mosaic_0001>

<bundles_post_ra>
// kernel: tpu_custom_call.1
= control target key start
LH: loop header
LB: loop body
LE: loop exit
PB: predicated region body
PF: predicated region fallthrough
CT: control target
= control target key end

     0   :  { %9 = vsyncpa [#allocation3], 0  ;;  %s222_s0 = inlined_call_operand.hbm [shape: f32[8,128], index: 0, kind: input, shape index: {}]   ;;  %s223_s1 = inlined_call_operand.hbm [shape: f32[8,128], index: 1, kind: input, shape index: {}]   ;;  %s224_s2 = inlined_call_operand.hbm [shape: f32[8,128], index: 2, kind: input, shape index: {}]   ;;  %s225_s3 = inlined_call_operand.vmem [shape: f32[1,128], index: 3, kind: input, shape index: {}]   ;;  %s226_s4 = inlined_call_operand.hbm [shape: f32[8,128], index: 4, kind: output, shape index: {}]  }
   0x1   :  { %10 = vsyncpa [#allocation6], 0 }
   0x2   :  { %11 = vsyncpa [#allocation4], 0  ;;  %s178_s15 = smov [#allocation5]   ;;  %s179_s17 = smov [#allocation2]  }
   0x3   :  { %s28_s16 = sshll.u32 %s178_s15, 4  ;;  %s18_s18 = sshll.u32 %s179_s17, 4  ;;  %s29_s16 = int_to_ptr.vmem [resolvable:$true] %s28_s16  ;;  %s19_s18 = int_to_ptr.vmem [resolvable:$true] %s18_s18 }
   0x4   :  { %s100_s19 = scalar_lea.vmem %s29_s16, 128  ;;  %p105_p1 = scmp.lt.s32.totalorder %s29_s16, %s29_s16 }
   0x5   :  { %p101_p0 = scmp.ne.s32.totalorder %s29_s16, %s100_s19  ;;  %p106_p2 = scmp.lt.s32.totalorder %s100_s19, %s100_s19 }
   0x7   :  { %p107_p3 = por %p106_p2, %p105_p1 }
   0x9   :  { %p108_p4 = pnand %p107_p3, %p101_p0 }
   0xb   :  { %111 = shalt.err (!%p108_p4)
}
   0xc   :  { %31 = dma.hbm_to_vmem [thread:$0]  %s223_s1, 128, %s29_s16, [#allocation6]  }
   0xd   :  { %s120_s22 = scalar_lea.vmem %s19_s18, 128  ;;  %p125_p6 = scmp.lt.s32.totalorder %s19_s18, %s19_s18 }
   0xe   :  { %p121_p5 = scmp.ne.s32.totalorder %s19_s18, %s120_s22  ;;  %p126_p7 = scmp.lt.s32.totalorder %s120_s22, %s120_s22 }
  0x10   :  { %p127_p8 = por %p126_p7, %p125_p6 }
  0x12   :  { %p128_p9 = pnand %p127_p8, %p121_p5 }
  0x14   :  { %131 = shalt.err (!%p128_p9)
}
  0x15   :  { %21 = dma.hbm_to_vmem [thread:$0]  %s222_s0, 128, %s19_s18, [#allocation3]  }
  0x16   :  { %s180_s25 = smov [#allocation7]  }
  0x17   :  { %s38_s26 = sshll.u32 %s180_s25, 4  ;;  %s39_s26 = int_to_ptr.vmem [resolvable:$true] %s38_s26 }
  0x18   :  { %s140_s27 = scalar_lea.vmem %s39_s26, 128  ;;  %p145_p11 = scmp.lt.s32.totalorder %s39_s26, %s39_s26 }
  0x19   :  { %p141_p10 = scmp.ne.s32.totalorder %s39_s26, %s140_s27  ;;  %p146_p12 = scmp.lt.s32.totalorder %s140_s27, %s140_s27 }
  0x1b   :  { %p147_p13 = por %p146_p12, %p145_p11 }
  0x1d   :  { %p148_p0 = pnand %p147_p13, %p141_p10 }
  0x1f   :  { %151 = shalt.err (!%p148_p0)
}
  0x20   :  { %41 = dma.hbm_to_vmem [thread:$0]  %s224_s2, 128, %s39_s26, [#allocation6]  }
  0x21   :  { %172 = dma.done.wait [#allocation3], 128  }
  0x22   :  { %173 = vsyncadd [#allocation3], 4294967168 }
  0x23   :  { %174 = dma.done.wait [#allocation6], 256  }
  0x24   :  { %175 = vsyncadd [#allocation6], 4294967040  ;;  %v53_v0 = vld [vmem:[#allocation7] sm:$0xff]  ;;  %v54_v1 = vld [vmem:[#allocation2] sm:$0xff]  ;;  %s181_s30 = smov [#allocation8]  }
  0x25   :  { %v56_v2 = vld [vmem:[#allocation5] sm:$0xff]  ;;  %v55_v3 = vmul.f32 %v54_v1, %v53_v0  ;;  %v85_v5 = vld [vmem:[%s225_s3] ss:$0 sm:$0xff]  ;;  %s75_s5 = sshll.u32 %s181_s30, 4  ;;  %s76_s5 = int_to_ptr.vmem [resolvable:$true] %s75_s5 }
  0x26   :  { %s152_s2 = scalar_lea.vmem %s76_s5, 128  ;;  %p157_p2 = scmp.lt.s32.totalorder %s76_s5, %s76_s5 }
  0x27   :  { %v57_v4 = vmul.f32 %v56_v2, %v55_v3  ;;  %p153_p1 = scmp.ne.s32.totalorder %s76_s5, %s152_s2  ;;  %p158_p3 = scmp.lt.s32.totalorder %s152_s2, %s152_s2 }
  0x29   :  { %v58_v6 = vadd.f32 %v57_v4, %v55_v3  ;;  %p159_p4 = por %p158_p3, %p157_p2 }
  0x2b   :  { %v66_v7 = vadd.f32 %v85_v5, %v58_v6  ;;  %p160_p5 = pnand %p159_p4, %p153_p1 }
  0x2d   :  { %90 = vtanh.f32 %v66_v7 }
  0x3a   :  { %v91_v8 = vpop.eup %90 }
  0x3b   :  { %68 = vst [vmem:[#allocation8] sm:$0xff] %v91_v8 }
  0x3c   :  { %163 = shalt.err (!%p160_p5)
}
  0x3d   :  { %78 = dma.vmem_to_hbm [thread:$0]  %s76_s5, 128, %s226_s4, [#allocation4]  }
  0x3e   :  { %176 = dma.done.wait [#allocation4], 128  }
  0x3f   :  { %177 = vsyncadd [#allocation4], 4294967168 }
  0x40   :  { %82 = vsyncpa [#allocation3], 1 }
  0x41   :  { %83 = vsyncpa [#allocation6], 1 }
  0x42   :  { %84 = vsyncpa [#allocation4], 1 }

</bundles_post_ra>
